<compile_context>
chip_gen: v6e
topology: v6e:2x2x1
jax: 0.10.0
libtpu: 0.0.40
codegen_flags: <defaults>
</compile_context>

<pallas_src>
import functools

import jax
import jax.numpy as jnp
from jax.experimental import pallas as pl
from jax.experimental.pallas import tpu as pltpu


# --------------------------------------------------------------------------
# Fused Pallas kernel: LayerNorm(x), LayerNorm_p(ps), cross-attention, out-proj
# --------------------------------------------------------------------------
def _prenorm_attn_kernel(x_ref, ps_ref, gx_ref, bx_ref, gp_ref, bp_ref,
                         wq_ref, wk_ref, wv_ref, wo_ref, bo_ref,
                         o_ref, *, heads, dim_head, eps):
    # One batch element per grid step; everything stays in VMEM/vregs.
    x = x_ref[0].astype(jnp.float32)          # (n, dim)
    p = ps_ref[0].astype(jnp.float32)         # (m, dim)

    def _ln(t, g, b):                         # PyTorch nn.LayerNorm, eps=1e-5
        mu = jnp.mean(t, axis=-1, keepdims=True)
        var = jnp.mean(jnp.square(t - mu), axis=-1, keepdims=True)
        return (t - mu) * jax.lax.rsqrt(var + eps) * g + b

    xn = _ln(x, gx_ref[...], bx_ref[...])     # (n, dim)   — self.norm(x)
    pn = _ln(p, gp_ref[...], bp_ref[...])     # (m, dim)   — self.norm_p(ps)

    # fn: multi-head cross-attention (q from x, k/v from partial structure).
    wq = wq_ref[...]                          # (dim, inner) — pre-transposed
    wk = wk_ref[...]
    wv = wv_ref[...]
    wo = wo_ref[...]                          # (inner, dim_out)

    q = jnp.dot(xn, wq, preferred_element_type=jnp.float32)   # (n, inner)
    k = jnp.dot(pn, wk, preferred_element_type=jnp.float32)   # (m, inner)
    v = jnp.dot(pn, wv, preferred_element_type=jnp.float32)   # (m, inner)

    n = x_ref.shape[1]
    dim_out = wo_ref.shape[1]
    scale = dim_head ** -0.5

    y = jnp.zeros((n, dim_out), jnp.float32)
    for h in range(heads):                    # static, unrolled (heads is tiny)
        lo, hi = h * dim_head, (h + 1) * dim_head
        qh, kh, vh = q[:, lo:hi], k[:, lo:hi], v[:, lo:hi]
        # q_h @ k_h^T without materializing a transpose.
        s = jax.lax.dot_general(qh, kh, (((1,), (1,)), ((), ())),
                                preferred_element_type=jnp.float32) * scale  # (n, m)
        s = s - jnp.max(s, axis=-1, keepdims=True)
        e = jnp.exp(s)
        a = e / jnp.sum(e, axis=-1, keepdims=True)
        oh = jnp.dot(a, vh, preferred_element_type=jnp.float32)             # (n, dh)
        # concat(heads) @ wo  ==  sum_h  o_h @ wo[rows of head h]  — no concat needed.
        y = y + jnp.dot(oh, wo[lo:hi, :], preferred_element_type=jnp.float32)

    y = y + bo_ref[...]                       # bias fused in-kernel
    o_ref[0] = y.astype(o_ref.dtype)


def prenorm_partial_structure(params, x, ps, *, heads, dim_head, eps=1e-5):
    """forward of PreNorm_partial_structure with fn = multi-head cross-attention."""
    b, n, dim = x.shape
    _, m, dim_p = ps.shape
    assert dim_p == dim
    inner = heads * dim_head
    dim_out = params["wo"].shape[1]

    # 1-D params reshaped once to lane-major (1, D) vectors.
    gx = params["g_x"].reshape(1, dim)
    bx = params["b_x"].reshape(1, dim)
    gp = params["g_p"].reshape(1, dim)
    bp = params["b_p"].reshape(1, dim)
    bo = params["bo"].reshape(1, dim_out)

    kernel = functools.partial(_prenorm_attn_kernel,
                               heads=heads, dim_head=dim_head, eps=eps)
    full2 = lambda i: (0, 0)                  # weights: single full-extent block

    return pl.pallas_call(
        kernel,
        out_shape=jax.ShapeDtypeStruct((b, n, dim_out), x.dtype),
        grid_spec=pltpu.PrefetchScalarGridSpec(
            num_scalar_prefetch=0,
            grid=(b,),
            in_specs=[
                pl.BlockSpec((1, n, dim), lambda i: (i, 0, 0)),   # x
                pl.BlockSpec((1, m, dim), lambda i: (i, 0, 0)),   # partial structure
                pl.BlockSpec((1, dim), full2),                    # LN gamma (x)
                pl.BlockSpec((1, dim), full2),                    # LN beta  (x)
                pl.BlockSpec((1, dim), full2),                    # LN gamma (ps)
                pl.BlockSpec((1, dim), full2),                    # LN beta  (ps)
                pl.BlockSpec((dim, inner), full2),                # wq (in, out)
                pl.BlockSpec((dim, inner), full2),                # wk
                pl.BlockSpec((dim, inner), full2),                # wv
                pl.BlockSpec((inner, dim_out), full2),            # wo
                pl.BlockSpec((1, dim_out), full2),                # bo
            ],
            out_specs=pl.BlockSpec((1, n, dim_out), lambda i: (i, 0, 0)),
        ),
        compiler_params=pltpu.CompilerParams(
            dimension_semantics=("parallel",)),                   # batch -> both TCs on v7x
    )(x, ps, gx, bx, gp, bp,
      params["wq"], params["wk"], params["wv"], params["wo"], bo)


# --------------------------------------------------------------------------
# Parameters & pure-JAX reference
# --------------------------------------------------------------------------
def init_params(key, dim, heads, dim_head, dim_out=None):
    dim_out = dim if dim_out is None else dim_out
    inner = heads * dim_head
    ks = jax.random.split(key, 4)
    scale = dim ** -0.5
    nrm = lambda k, shape: scale * jax.random.normal(k, shape, jnp.float32)
    return {
        # PreNorm_partial_structure's own parameters (the two LayerNorms).
        "g_x": jnp.ones((dim,), jnp.float32), "b_x": jnp.zeros((dim,), jnp.float32),
        "g_p": jnp.ones((dim,), jnp.float32), "b_p": jnp.zeros((dim,), jnp.float32),
        # fn (cross-attention) weights, stored pre-transposed as (in, out) so the
        # kernel never re-transposes per call (PyTorch stores nn.Linear as (out, in)).
        "wq": nrm(ks[0], (dim, inner)),
        "wk": nrm(ks[1], (dim, inner)),
        "wv": nrm(ks[2], (dim, inner)),
        "wo": nrm(ks[3], (inner, dim_out)),
        "bo": jnp.zeros((dim_out,), jnp.float32),
    }


def reference(params, x, ps, heads, dim_head, eps=1e-5):
    def ln(t, g, b):
        mu = t.mean(-1, keepdims=True)
        var = ((t - mu) ** 2).mean(-1, keepdims=True)
        return (t - mu) / jnp.sqrt(var + eps) * g + b

    xn = ln(x, params["g_x"], params["b_x"])
    pn = ln(ps, params["g_p"], params["b_p"])
    b, n, _ = x.shape
    m = ps.shape[1]
    q = (xn @ params["wq"]).reshape(b, n, heads, dim_head).transpose(0, 2, 1, 3)
    k = (pn @ params["wk"]).reshape(b, m, heads, dim_head).transpose(0, 2, 1, 3)
    v = (pn @ params["wv"]).reshape(b, m, heads, dim_head).transpose(0, 2, 1, 3)
    s = jnp.einsum("bhnd,bhmd->bhnm", q, k) * dim_head ** -0.5
    a = jax.nn.softmax(s, axis=-1)
    o = jnp.einsum("bhnm,bhmd->bhnd", a, v)
    o = o.transpose(0, 2, 1, 3).reshape(b, n, heads * dim_head)
    return o @ params["wo"] + params["bo"]


# --------------------------------------------------------------------------
if __name__ == "__main__":
    key = jax.random.PRNGKey(0)
    B, N, M, DIM, HEADS, DIM_HEAD = 2, 8, 16, 32, 2, 16

    kx, kp, kw = jax.random.split(key, 3)
    x = jax.random.normal(kx, (B, N, DIM), jnp.float32)
    ps = jax.random.normal(kp, (B, M, DIM), jnp.float32)
    params = init_params(kw, DIM, HEADS, DIM_HEAD)

    fwd = jax.jit(functools.partial(prenorm_partial_structure,
                                    heads=HEADS, dim_head=DIM_HEAD))
    out = fwd(params, x, ps)
    jax.block_until_ready(out)

    ref = reference(params, x, ps, HEADS, DIM_HEAD)
    assert out.shape == (B, N, DIM), out.shape
    assert bool(jnp.all(jnp.isfinite(out)))
    err = float(jnp.max(jnp.abs(out - ref)))
    assert err < 1e-4, f"mismatch vs reference: {err}"
    print("KERNEL_OK")
</pallas_src>

<mosaic_0001>
module attributes {stable_mosaic.version = 11 : i64} {
  func.func @_prenorm_attn_kernel(%arg0: i32, %arg1: memref<1x8x32xf32, #tpu.memory_space<vmem>>, %arg2: memref<1x16x32xf32, #tpu.memory_space<vmem>>, %arg3: memref<1x32xf32, #tpu.memory_space<vmem>>, %arg4: memref<1x32xf32, #tpu.memory_space<vmem>>, %arg5: memref<1x32xf32, #tpu.memory_space<vmem>>, %arg6: memref<1x32xf32, #tpu.memory_space<vmem>>, %arg7: memref<32x32xf32, #tpu.memory_space<vmem>>, %arg8: memref<32x32xf32, #tpu.memory_space<vmem>>, %arg9: memref<32x32xf32, #tpu.memory_space<vmem>>, %arg10: memref<32x32xf32, #tpu.memory_space<vmem>>, %arg11: memref<1x32xf32, #tpu.memory_space<vmem>>, %arg12: memref<1x8x32xf32, #tpu.memory_space<vmem>>) attributes {dimension_semantics = [#tpu.dimension_semantics<parallel>], iteration_bounds = array<i64: 2>, scalar_prefetch = 0 : i64, scratch_operands = 0 : i64, tpu.core_type = #tpu.core_type<tc>, window_params = [{transform_indices = @transform_0, window_bounds = array<i64: 1, 8, 32>}, {transform_indices = @transform_1, window_bounds = array<i64: 1, 16, 32>}, {pipeline_mode = #tpu.pipeline_mode<synchronous>, transform_indices = @transform_2, window_bounds = array<i64: 1, 32>}, {pipeline_mode = #tpu.pipeline_mode<synchronous>, transform_indices = @transform_3, window_bounds = array<i64: 1, 32>}, {pipeline_mode = #tpu.pipeline_mode<synchronous>, transform_indices = @transform_4, window_bounds = array<i64: 1, 32>}, {pipeline_mode = #tpu.pipeline_mode<synchronous>, transform_indices = @transform_5, window_bounds = array<i64: 1, 32>}, {pipeline_mode = #tpu.pipeline_mode<synchronous>, transform_indices = @transform_6, window_bounds = array<i64: 32, 32>}, {pipeline_mode = #tpu.pipeline_mode<synchronous>, transform_indices = @transform_7, window_bounds = array<i64: 32, 32>}, {pipeline_mode = #tpu.pipeline_mode<synchronous>, transform_indices = @transform_8, window_bounds = array<i64: 32, 32>}, {pipeline_mode = #tpu.pipeline_mode<synchronous>, transform_indices = @transform_9, window_bounds = array<i64: 32, 32>}, {pipeline_mode = #tpu.pipeline_mode<synchronous>, transform_indices = @transform_10, window_bounds = array<i64: 1, 32>}, {transform_indices = @transform_11, window_bounds = array<i64: 1, 8, 32>}]} {
    %c0 = arith.constant 0 : index
    %c0_0 = arith.constant 0 : index
    %c0_1 = arith.constant 0 : index
    %0 = vector.load %arg1[%c0, %c0_0, %c0_1] : memref<1x8x32xf32, #tpu.memory_space<vmem>>, vector<1x8x32xf32>
    %1 = vector.shape_cast %0 : vector<1x8x32xf32> to vector<8x32xf32>
    %c0_2 = arith.constant 0 : index
    %c0_3 = arith.constant 0 : index
    %c0_4 = arith.constant 0 : index
    %2 = vector.load %arg2[%c0_2, %c0_3, %c0_4] : memref<1x16x32xf32, #tpu.memory_space<vmem>>, vector<1x16x32xf32>
    %3 = vector.shape_cast %2 : vector<1x16x32xf32> to vector<16x32xf32>
    %c0_5 = arith.constant 0 : index
    %c0_6 = arith.constant 0 : index
    %4 = vector.load %arg3[%c0_5, %c0_6] : memref<1x32xf32, #tpu.memory_space<vmem>>, vector<1x32xf32>
    %c0_7 = arith.constant 0 : index
    %c0_8 = arith.constant 0 : index
    %5 = vector.load %arg4[%c0_7, %c0_8] : memref<1x32xf32, #tpu.memory_space<vmem>>, vector<1x32xf32>
    %cst = arith.constant dense<0.000000e+00> : vector<8xf32>
    %6 = vector.multi_reduction <add>, %1, %cst [1] : vector<8x32xf32> to vector<8xf32>
    %7 = vector.shape_cast %6 : vector<8xf32> to vector<8x1xf32>
    %cst_9 = arith.constant 3.200000e+01 : f32
    %8 = vector.broadcast %cst_9 : f32 to vector<8x1xf32>
    %9 = arith.divf %7, %8 : vector<8x1xf32>
    %10 = vector.broadcast %9 : vector<8x1xf32> to vector<8x32xf32>
    %11 = arith.subf %1, %10 : vector<8x32xf32>
    %12 = arith.mulf %11, %11 : vector<8x32xf32>
    %cst_10 = arith.constant dense<0.000000e+00> : vector<8xf32>
    %13 = vector.multi_reduction <add>, %12, %cst_10 [1] : vector<8x32xf32> to vector<8xf32>
    %14 = vector.shape_cast %13 : vector<8xf32> to vector<8x1xf32>
    %cst_11 = arith.constant 3.200000e+01 : f32
    %15 = vector.broadcast %cst_11 : f32 to vector<8x1xf32>
    %16 = arith.divf %14, %15 : vector<8x1xf32>
    %17 = vector.broadcast %9 : vector<8x1xf32> to vector<8x32xf32>
    %18 = arith.subf %1, %17 : vector<8x32xf32>
    %cst_12 = arith.constant 9.99999974E-6 : f32
    %19 = vector.broadcast %cst_12 : f32 to vector<8x1xf32>
    %20 = arith.addf %16, %19 : vector<8x1xf32>
    %21 = math.rsqrt %20 : vector<8x1xf32>
    %22 = vector.broadcast %21 : vector<8x1xf32> to vector<8x32xf32>
    %23 = arith.mulf %18, %22 : vector<8x32xf32>
    %24 = vector.broadcast %4 : vector<1x32xf32> to vector<8x32xf32>
    %25 = arith.mulf %23, %24 : vector<8x32xf32>
    %26 = vector.broadcast %5 : vector<1x32xf32> to vector<8x32xf32>
    %27 = arith.addf %25, %26 : vector<8x32xf32>
    %c0_13 = arith.constant 0 : index
    %c0_14 = arith.constant 0 : index
    %28 = vector.load %arg5[%c0_13, %c0_14] : memref<1x32xf32, #tpu.memory_space<vmem>>, vector<1x32xf32>
    %c0_15 = arith.constant 0 : index
    %c0_16 = arith.constant 0 : index
    %29 = vector.load %arg6[%c0_15, %c0_16] : memref<1x32xf32, #tpu.memory_space<vmem>>, vector<1x32xf32>
    %cst_17 = arith.constant dense<0.000000e+00> : vector<16xf32>
    %30 = vector.multi_reduction <add>, %3, %cst_17 [1] : vector<16x32xf32> to vector<16xf32>
    %31 = vector.shape_cast %30 : vector<16xf32> to vector<16x1xf32>
    %cst_18 = arith.constant 3.200000e+01 : f32
    %32 = vector.broadcast %cst_18 : f32 to vector<16x1xf32>
    %33 = arith.divf %31, %32 : vector<16x1xf32>
    %34 = vector.broadcast %33 : vector<16x1xf32> to vector<16x32xf32>
    %35 = arith.subf %3, %34 : vector<16x32xf32>
    %36 = arith.mulf %35, %35 : vector<16x32xf32>
    %cst_19 = arith.constant dense<0.000000e+00> : vector<16xf32>
    %37 = vector.multi_reduction <add>, %36, %cst_19 [1] : vector<16x32xf32> to vector<16xf32>
    %38 = vector.shape_cast %37 : vector<16xf32> to vector<16x1xf32>
    %cst_20 = arith.constant 3.200000e+01 : f32
    %39 = vector.broadcast %cst_20 : f32 to vector<16x1xf32>
    %40 = arith.divf %38, %39 : vector<16x1xf32>
    %41 = vector.broadcast %33 : vector<16x1xf32> to vector<16x32xf32>
    %42 = arith.subf %3, %41 : vector<16x32xf32>
    %cst_21 = arith.constant 9.99999974E-6 : f32
    %43 = vector.broadcast %cst_21 : f32 to vector<16x1xf32>
    %44 = arith.addf %40, %43 : vector<16x1xf32>
    %45 = math.rsqrt %44 : vector<16x1xf32>
    %46 = vector.broadcast %45 : vector<16x1xf32> to vector<16x32xf32>
    %47 = arith.mulf %42, %46 : vector<16x32xf32>
    %48 = vector.broadcast %28 : vector<1x32xf32> to vector<16x32xf32>
    %49 = arith.mulf %47, %48 : vector<16x32xf32>
    %50 = vector.broadcast %29 : vector<1x32xf32> to vector<16x32xf32>
    %51 = arith.addf %49, %50 : vector<16x32xf32>
    %c0_22 = arith.constant 0 : index
    %c0_23 = arith.constant 0 : index
    %52 = vector.load %arg7[%c0_22, %c0_23] : memref<32x32xf32, #tpu.memory_space<vmem>>, vector<32x32xf32>
    %c0_24 = arith.constant 0 : index
    %c0_25 = arith.constant 0 : index
    %53 = vector.load %arg8[%c0_24, %c0_25] : memref<32x32xf32, #tpu.memory_space<vmem>>, vector<32x32xf32>
    %c0_26 = arith.constant 0 : index
    %c0_27 = arith.constant 0 : index
    %54 = vector.load %arg9[%c0_26, %c0_27] : memref<32x32xf32, #tpu.memory_space<vmem>>, vector<32x32xf32>
    %c0_28 = arith.constant 0 : index
    %c0_29 = arith.constant 0 : index
    %55 = vector.load %arg10[%c0_28, %c0_29] : memref<32x32xf32, #tpu.memory_space<vmem>>, vector<32x32xf32>
    %cst_30 = arith.constant dense<0.000000e+00> : vector<8x32xf32>
    %56 = tpu.matmul %27, %52, %cst_30 {dimension_numbers = #tpu.dot_dimension_numbers<[1], [0], [0], [1], [0, 0, 1, 1], [], []>} : vector<8x32xf32>, vector<32x32xf32>, vector<8x32xf32> -> vector<8x32xf32>
    %cst_31 = arith.constant dense<0.000000e+00> : vector<16x32xf32>
    %57 = tpu.matmul %51, %53, %cst_31 {dimension_numbers = #tpu.dot_dimension_numbers<[1], [0], [0], [1], [0, 0, 1, 1], [], []>} : vector<16x32xf32>, vector<32x32xf32>, vector<16x32xf32> -> vector<16x32xf32>
    %cst_32 = arith.constant dense<0.000000e+00> : vector<16x32xf32>
    %58 = tpu.matmul %51, %54, %cst_32 {dimension_numbers = #tpu.dot_dimension_numbers<[1], [0], [0], [1], [0, 0, 1, 1], [], []>} : vector<16x32xf32>, vector<32x32xf32>, vector<16x32xf32> -> vector<16x32xf32>
    %cst_33 = arith.constant 0.000000e+00 : f32
    %59 = vector.broadcast %cst_33 : f32 to vector<8x32xf32>
    %60 = vector.extract_strided_slice %56 {offsets = [0, 0], sizes = [8, 16], strides = [1, 1]} : vector<8x32xf32> to vector<8x16xf32>
    %61 = vector.extract_strided_slice %57 {offsets = [0, 0], sizes = [16, 16], strides = [1, 1]} : vector<16x32xf32> to vector<16x16xf32>
    %62 = vector.extract_strided_slice %58 {offsets = [0, 0], sizes = [16, 16], strides = [1, 1]} : vector<16x32xf32> to vector<16x16xf32>
    %cst_34 = arith.constant dense<0.000000e+00> : vector<8x16xf32>
    %63 = tpu.matmul %60, %61, %cst_34 {dimension_numbers = #tpu.dot_dimension_numbers<[1], [1], [0], [0], [0, 0, 1, 0], [], []>} : vector<8x16xf32>, vector<16x16xf32>, vector<8x16xf32> -> vector<8x16xf32>
    %cst_35 = arith.constant 2.500000e-01 : f32
    %64 = vector.broadcast %cst_35 : f32 to vector<8x16xf32>
    %65 = arith.mulf %63, %64 : vector<8x16xf32>
    %cst_36 = arith.constant dense<0xFF800000> : vector<8xf32>
    %66 = vector.multi_reduction <maximumf>, %65, %cst_36 [1] : vector<8x16xf32> to vector<8xf32>
    %67 = vector.shape_cast %66 : vector<8xf32> to vector<8x1xf32>
    %68 = vector.broadcast %67 : vector<8x1xf32> to vector<8x16xf32>
    %69 = arith.subf %65, %68 : vector<8x16xf32>
    %70 = math.exp %69 : vector<8x16xf32>
    %cst_37 = arith.constant dense<0.000000e+00> : vector<8xf32>
    %71 = vector.multi_reduction <add>, %70, %cst_37 [1] : vector<8x16xf32> to vector<8xf32>
    %72 = vector.shape_cast %71 : vector<8xf32> to vector<8x1xf32>
    %73 = vector.broadcast %72 : vector<8x1xf32> to vector<8x16xf32>
    %74 = arith.divf %70, %73 : vector<8x16xf32>
    %cst_38 = arith.constant dense<0.000000e+00> : vector<8x16xf32>
    %75 = tpu.matmul %74, %62, %cst_38 {dimension_numbers = #tpu.dot_dimension_numbers<[1], [0], [0], [1], [0, 0, 1, 1], [], []>} : vector<8x16xf32>, vector<16x16xf32>, vector<8x16xf32> -> vector<8x16xf32>
    %76 = vector.extract_strided_slice %55 {offsets = [0, 0], sizes = [16, 32], strides = [1, 1]} : vector<32x32xf32> to vector<16x32xf32>
    %cst_39 = arith.constant dense<0.000000e+00> : vector<8x32xf32>
    %77 = tpu.matmul %75, %76, %cst_39 {dimension_numbers = #tpu.dot_dimension_numbers<[1], [0], [0], [1], [0, 0, 1, 1], [], []>} : vector<8x16xf32>, vector<16x32xf32>, vector<8x32xf32> -> vector<8x32xf32>
    %78 = arith.addf %59, %77 : vector<8x32xf32>
    %79 = vector.extract_strided_slice %56 {offsets = [0, 16], sizes = [8, 16], strides = [1, 1]} : vector<8x32xf32> to vector<8x16xf32>
    %80 = vector.extract_strided_slice %57 {offsets = [0, 16], sizes = [16, 16], strides = [1, 1]} : vector<16x32xf32> to vector<16x16xf32>
    %81 = vector.extract_strided_slice %58 {offsets = [0, 16], sizes = [16, 16], strides = [1, 1]} : vector<16x32xf32> to vector<16x16xf32>
    %cst_40 = arith.constant dense<0.000000e+00> : vector<8x16xf32>
    %82 = tpu.matmul %79, %80, %cst_40 {dimension_numbers = #tpu.dot_dimension_numbers<[1], [1], [0], [0], [0, 0, 1, 0], [], []>} : vector<8x16xf32>, vector<16x16xf32>, vector<8x16xf32> -> vector<8x16xf32>
    %cst_41 = arith.constant 2.500000e-01 : f32
    %83 = vector.broadcast %cst_41 : f32 to vector<8x16xf32>
    %84 = arith.mulf %82, %83 : vector<8x16xf32>
    %cst_42 = arith.constant dense<0xFF800000> : vector<8xf32>
    %85 = vector.multi_reduction <maximumf>, %84, %cst_42 [1] : vector<8x16xf32> to vector<8xf32>
    %86 = vector.shape_cast %85 : vector<8xf32> to vector<8x1xf32>
    %87 = vector.broadcast %86 : vector<8x1xf32> to vector<8x16xf32>
    %88 = arith.subf %84, %87 : vector<8x16xf32>
    %89 = math.exp %88 : vector<8x16xf32>
    %cst_43 = arith.constant dense<0.000000e+00> : vector<8xf32>
    %90 = vector.multi_reduction <add>, %89, %cst_43 [1] : vector<8x16xf32> to vector<8xf32>
    %91 = vector.shape_cast %90 : vector<8xf32> to vector<8x1xf32>
    %92 = vector.broadcast %91 : vector<8x1xf32> to vector<8x16xf32>
    %93 = arith.divf %89, %92 : vector<8x16xf32>
    %cst_44 = arith.constant dense<0.000000e+00> : vector<8x16xf32>
    %94 = tpu.matmul %93, %81, %cst_44 {dimension_numbers = #tpu.dot_dimension_numbers<[1], [0], [0], [1], [0, 0, 1, 1], [], []>} : vector<8x16xf32>, vector<16x16xf32>, vector<8x16xf32> -> vector<8x16xf32>
    %95 = vector.extract_strided_slice %55 {offsets = [16, 0], sizes = [16, 32], strides = [1, 1]} : vector<32x32xf32> to vector<16x32xf32>
    %cst_45 = arith.constant dense<0.000000e+00> : vector<8x32xf32>
    %96 = tpu.matmul %94, %95, %cst_45 {dimension_numbers = #tpu.dot_dimension_numbers<[1], [0], [0], [1], [0, 0, 1, 1], [], []>} : vector<8x16xf32>, vector<16x32xf32>, vector<8x32xf32> -> vector<8x32xf32>
    %97 = arith.addf %78, %96 : vector<8x32xf32>
    %c0_46 = arith.constant 0 : index
    %c0_47 = arith.constant 0 : index
    %98 = vector.load %arg11[%c0_46, %c0_47] : memref<1x32xf32, #tpu.memory_space<vmem>>, vector<1x32xf32>
    %99 = vector.broadcast %98 : vector<1x32xf32> to vector<8x32xf32>
    %100 = arith.addf %97, %99 : vector<8x32xf32>
    %c0_48 = arith.constant 0 : index
    %c0_49 = arith.constant 0 : index
    %c0_50 = arith.constant 0 : index
    %101 = vector.load %arg12[%c0_48, %c0_49, %c0_50] : memref<1x8x32xf32, #tpu.memory_space<vmem>>, vector<1x8x32xf32>
    %102 = vector.shape_cast %101 : vector<1x8x32xf32> to vector<8x32xf32>
    %103 = vector.shape_cast %100 : vector<8x32xf32> to vector<1x8x32xf32>
    tpu.vector_store %arg12[%c0_48, %c0_49, %c0_50], %103 {strides = array<i32>} : memref<1x8x32xf32, #tpu.memory_space<vmem>>, vector<1x8x32xf32>,
    return
  }
  func.func @transform_0(%arg0: i32) -> (i32, i32, i32) {
    %c0_i32 = arith.constant 0 : i32
    %c0_i32_0 = arith.constant 0 : i32
    %c0_i32_1 = arith.constant 0 : i32
    return %arg0, %c0_i32, %c0_i32_0 : i32, i32, i32
  }
  func.func @transform_1(%arg0: i32) -> (i32, i32, i32) {
    %c0_i32 = arith.constant 0 : i32
    %c0_i32_0 = arith.constant 0 : i32
    %c0_i32_1 = arith.constant 0 : i32
    return %arg0, %c0_i32, %c0_i32_0 : i32, i32, i32
  }
  func.func @transform_2(%arg0: i32) -> (i32, i32) {
    %c0_i32 = arith.constant 0 : i32
    %c0_i32_0 = arith.constant 0 : i32
    %c0_i32_1 = arith.constant 0 : i32
    return %c0_i32, %c0_i32_0 : i32, i32
  }
  func.func @transform_3(%arg0: i32) -> (i32, i32) {
    %c0_i32 = arith.constant 0 : i32
    %c0_i32_0 = arith.constant 0 : i32
    %c0_i32_1 = arith.constant 0 : i32
    return %c0_i32, %c0_i32_0 : i32, i32
  }
  func.func @transform_4(%arg0: i32) -> (i32, i32) {
    %c0_i32 = arith.constant 0 : i32
    %c0_i32_0 = arith.constant 0 : i32
    %c0_i32_1 = arith.constant 0 : i32
    return %c0_i32, %c0_i32_0 : i32, i32
  }
  func.func @transform_5(%arg0: i32) -> (i32, i32) {
    %c0_i32 = arith.constant 0 : i32
    %c0_i32_0 = arith.constant 0 : i32
    %c0_i32_1 = arith.constant 0 : i32
    return %c0_i32, %c0_i32_0 : i32, i32
  }
  func.func @transform_6(%arg0: i32) -> (i32, i32) {
    %c0_i32 = arith.constant 0 : i32
    %c0_i32_0 = arith.constant 0 : i32
    %c0_i32_1 = arith.constant 0 : i32
    return %c0_i32, %c0_i32_0 : i32, i32
  }
  func.func @transform_7(%arg0: i32) -> (i32, i32) {
    %c0_i32 = arith.constant 0 : i32
    %c0_i32_0 = arith.constant 0 : i32
    %c0_i32_1 = arith.constant 0 : i32
    return %c0_i32, %c0_i32_0 : i32, i32
  }
  func.func @transform_8(%arg0: i32) -> (i32, i32) {
    %c0_i32 = arith.constant 0 : i32
    %c0_i32_0 = arith.constant 0 : i32
    %c0_i32_1 = arith.constant 0 : i32
    return %c0_i32, %c0_i32_0 : i32, i32
  }
  func.func @transform_9(%arg0: i32) -> (i32, i32) {
    %c0_i32 = arith.constant 0 : i32
    %c0_i32_0 = arith.constant 0 : i32
    %c0_i32_1 = arith.constant 0 : i32
    return %c0_i32, %c0_i32_0 : i32, i32
  }
  func.func @transform_10(%arg0: i32) -> (i32, i32) {
    %c0_i32 = arith.constant 0 : i32
    %c0_i32_0 = arith.constant 0 : i32
    %c0_i32_1 = arith.constant 0 : i32
    return %c0_i32, %c0_i32_0 : i32, i32
  }
  func.func @transform_11(%arg0: i32) -> (i32, i32, i32) {
    %c0_i32 = arith.constant 0 : i32
    %c0_i32_0 = arith.constant 0 : i32
    %c0_i32_1 = arith.constant 0 : i32
    return %arg0, %c0_i32, %c0_i32_0 : i32, i32, i32
  }
}

</mosaic_0001>

<bundles_post_ra>
// kernel: prenorm_partial_structure.1
= control target key start
LH: loop header
LB: loop body
LE: loop exit
PB: predicated region body
PF: predicated region fallthrough
CT: control target
= control target key end

     0   :  { %s2264_s0 = inlined_call_operand.vmem [shape: f32[2,8,32], index: 0, kind: input, shape index: {}]   ;;  %s2265_s1 = inlined_call_operand.hbm [shape: f32[2,16,32], index: 1, kind: input, shape index: {}]   ;;  %s2266_s2 = inlined_call_operand.vmem [shape: f32[1,32], index: 2, kind: input, shape index: {}]   ;;  %s2267_s3 = inlined_call_operand.vmem [shape: f32[1,32], index: 3, kind: input, shape index: {}]   ;;  %s2268_s4 = inlined_call_operand.vmem [shape: f32[1,32], index: 4, kind: input, shape index: {}]   ;;  %s2269_s5 = inlined_call_operand.vmem [shape: f32[1,32], index: 5, kind: input, shape index: {}]   ;;  %s2270_s6 = inlined_call_operand.hbm [shape: f32[32,32], index: 6, kind: input, shape index: {}]   ;;  %s2271_s7 = inlined_call_operand.hbm [shape: f32[32,32], index: 7, kind: input, shape index: {}]   ;;  %s2272_s8 = inlined_call_operand.hbm [shape: f32[32,32], index: 8, kind: input, shape index: {}]   ;;  %s2273_s9 = inlined_call_operand.hbm [shape: f32[32,32], index: 9, kind: input, shape index: {}]   ;;  %s2274_s10 = inlined_call_operand.vmem [shape: f32[1,32], index: 10, kind: input, shape index: {}]   ;;  %s2275_s11 = inlined_call_operand.hbm [shape: f32[2,8,32], index: 11, kind: output, shape index: {}]  }
   0x1   :  { %2282 = sst [smem:[#allocation17_spill]] %s2270_s6 }
   0x2   :  { %2283 = sst [smem:[#allocation18_spill]] %s2271_s7 }
   0x3   :  { %2284 = sst [smem:[#allocation19_spill]] %s2272_s8 }
   0x4   :  { %2285 = sst [smem:[#allocation20_spill]] %s2273_s9 }
   0x5   :  { %16 = vsyncpa [#allocation3], 0 }
   0x6   :  { %18 = vsyncpa [#allocation3 + $0x1], 0 }
   0x7   :  { %19 = vsyncpa [#allocation6], 0 }
   0x8   :  { %20 = vsyncpa [#allocation9], 0 }
   0x9   :  { %21 = vsyncpa [#allocation4], 0 }
   0xa   :  { %23 = vsyncpa [#allocation4 + $0x1], 0  ;;  %s1968_s17 = smov 0   ;;  %s1970_s18 = smov 0  }
   0xb   :  { %s1972_s19 = smov 0   ;;  %s1974_s20 = smov 0  }
   0xc LB: > { %s1989_s21 = sadd.s32 4294967295, %s1895_s20   ;;  %s1432_s22 = sadd.s32 4294967294, %s1895_s20   ;;  %s1895_s20 = sphi %s1974_s20, %s2312_s20   ;;  %s1891_s19 = sphi %s1972_s19, %s2311_s19   ;;  %s1887_s18 = sphi %s1970_s18, %s2310_s18   ;;  %s1883_s17 = sphi %s1968_s17, %s2309_s17  }
   0xd   : > { %p75_p0 = scmp.ne.s32.totalorder %s1887_s18, %s1883_s17  ;;  %p2276_p1 = scmp.eq.s32.totalorder %s1989_s21, 0 }
   0xe   : > { %p288_p2 = scmp.eq.s32.totalorder %s1989_s21, 1  ;;  %p294_p3 = scmp.eq.s32.totalorder %s1432_s22, 1 }
   0xf   : > { %p1998_p4 = por %p2276_p1, %p75_p0  ;;  %p1433_p5 = scmp.ge.s32.totalorder %s1895_s20, 1 }
  0x10   : > { %p2003_p6 = por %p294_p3, %p75_p0  ;;  %p301_p7 = scmp.lt.s32.totalorder %s1895_s20, 3 }
  0x11   : > { %s2286_s23 = scalar_select %p1998_p4, 1, 0 }
  0x12   : > { %s2287_s24 = scalar_select %p2003_p6, 1, 0 }
  0x13   : > { %p2008_p8 = pnand %p1433_p5, %p301_p7  ;;  %s1897_s26 = smov [#allocation5]  }
  0x14   : > { %s325_s27 = sshll.u32 %s1897_s26, 4  ;;  %s1898_s29 = smov [#allocation8]   ;;  %s326_s27 = int_to_ptr.vmem [resolvable:$true] %s325_s27 }
  0x15   : > { %s2288_s25 = scalar_select %p2008_p8, 1, 0 }
  0x16   : > { %p1605_p9 = pneg %p2008_p8  ;;  %s351_s30 = sshll.u32 %s1898_s29, 4  ;;  %s352_s30 = int_to_ptr.vmem [resolvable:$true] %s351_s30 }
  0x17   : > { %s1899_s12 = smov [#allocation7]   ;;  %s1702_s14 = scalar_lea.vmem %s326_s27, 512 }
  0x18   : > { %p2017_p11 = pnand %p1605_p9, %p2276_p1  ;;  %s338_s13 = sshll.u32 %s1899_s12, 4  ;;  %s339_s13 = int_to_ptr.vmem [resolvable:$true] %s338_s13 }
  0x19   : > { %p1703_p13 = scmp.ne.s32.totalorder %s326_s27, %s1702_s14  ;;  %p1710_p5 = scmp.lt.s32.totalorder %s326_s27, %s326_s27 }
  0x1a   : > { %p1693_p12 = pneg %p2017_p11  ;;  %p1711_p7 = scmp.lt.s32.totalorder %s1702_s14, %s1702_s14 }
  0x1c   : > { %p1705_p0 = pnand %p1703_p13, %p1693_p12  ;;  %p1712_p9 = por %p1711_p7, %p1710_p5 }
  0x1e   : > { %p1706_p3 = pneg %p1705_p0 }
  0x20   : > { %p1713_p10 = pnand %p1712_p9, %p1706_p3 }
  0x22   : > { %1716 = shalt.err (!%p1713_p10)
}
  0x23   : > { %s2277_s15 = smov 128   ;;  %s2278_s16 = smov 8  }
  0x24   : > { %s2290_s6 = sld [smem:[#allocation17_spill]]  ;;  %s1728_s29 = scalar_lea.vmem %s352_s30, 512 }
  0x25   : > { %p1729_p13 = scmp.ne.s32.totalorder %s352_s30, %s1728_s29  ;;  %p1736_p3 = scmp.lt.s32.totalorder %s352_s30, %s352_s30 }
  0x26   : > { %p1737_p10 = scmp.lt.s32.totalorder %s1728_s29, %s1728_s29 }
  0x27   : > { %p1731_p0 = pnand %p1729_p13, %p1693_p12 }
  0x28   : > { %p1738_p7 = por %p1737_p10, %p1736_p3 }
  0x29   : > { %p1732_p5 = pneg %p1731_p0 }
  0x2a   : > { %1608 = dma.hbm_to_vmem [thread:$0]  (!%p2017_p11), %s2290_s6, 512, %s326_s27, [#allocation6], %s2277_s15, %s2277_s15, %s2278_s16  }
  0x2b   : > { %p1739_p9 = pnand %p1738_p7, %p1732_p5 }
  0x2d   : > { %1742 = shalt.err (!%p1739_p9)
}
  0x2e   : > { %s2291_s8 = sld [smem:[#allocation19_spill]]  ;;  %s1754_s27 = scalar_lea.vmem %s339_s13, 512 }
  0x2f   : > { %p1755_p1 = scmp.ne.s32.totalorder %s339_s13, %s1754_s27  ;;  %p1762_p3 = scmp.lt.s32.totalorder %s339_s13, %s339_s13 }
  0x30   : > { %p1763_p5 = scmp.lt.s32.totalorder %s1754_s27, %s1754_s27 }
  0x31   : > { %p1757_p13 = pnand %p1755_p1, %p1693_p12 }
  0x32   : > { %p1764_p10 = por %p1763_p5, %p1762_p3 }
  0x33   : > { %p1758_p0 = pneg %p1757_p13 }
  0x34   : > { %1614 = dma.hbm_to_vmem [thread:$0]  (!%p2017_p11), %s2291_s8, 512, %s352_s30, [#allocation9], %s2277_s15, %s2277_s15, %s2278_s16  }
  0x35   : > { %p1765_p7 = pnand %p1764_p10, %p1758_p0 }
  0x37   : > { %1768 = shalt.err (!%p1765_p7)
}
  0x38   : > { %s2292_s7 = sld [smem:[#allocation18_spill]]  ;;  %s1902_s30 = smov [#allocation10]  }
  0x39   : > { %s364_s29 = sshll.u32 %s1902_s30, 4  ;;  %s365_s29 = int_to_ptr.vmem [resolvable:$true] %s364_s29 }
  0x3a   : > { %s1780_s12 = scalar_lea.vmem %s365_s29, 512  ;;  %p1788_p0 = scmp.lt.s32.totalorder %s365_s29, %s365_s29 }
  0x3b   : > { %p1781_p1 = scmp.ne.s32.totalorder %s365_s29, %s1780_s12  ;;  %p1789_p3 = scmp.lt.s32.totalorder %s1780_s12, %s1780_s12 }
  0x3d   : > { %p1783_p9 = pnand %p1781_p1, %p1693_p12  ;;  %p1790_p5 = por %p1789_p3, %p1788_p0 }
  0x3e   : > { %1611 = dma.hbm_to_vmem [thread:$0]  (!%p2017_p11), %s2292_s7, 512, %s339_s13, [#allocation6], %s2277_s15, %s2277_s15, %s2278_s16  }
  0x3f   : > { %p1784_p13 = pneg %p1783_p9 }
  0x41   : > { %p1791_p10 = pnand %p1790_p5, %p1784_p13 }
  0x43   : > { %1794 = shalt.err (!%p1791_p10)
}
  0x44   : > { %s2293_s9 = sld [smem:[#allocation20_spill]]  ;;  %s2068_s27 = sadd.s32 1, %s1895_s20  }
  0x45   : > { %s62_s28 = sadd.s32 1, %s1891_s19  ;;  %s59_s22 = ssub.s32 %s1895_s20, %s2068_s27 }
  0x46   : > { %p69_p12 = scmp.ne.s32.totalorder %s1891_s19, %s1887_s18  ;;  %p60_p7 = scmp.eq.s32.totalorder %s59_s22, 0 }
  0x47   : > { %p70_p1 = scmp.eq.s32.totalorder %s1895_s20, 0  ;;  %p1630_p13 = scmp.lt.s32.totalorder %s1895_s20, 2 }
  0x48   : > { %p2078_p9 = por %p288_p2, %p69_p12  ;;  %s388_s12 = sand.u32 1, %s1891_s19  }
  0x49   : > { %s2084_s30 = scalar_select %p60_p7, %s1891_s19, %s62_s28  }
  0x4a   : > { %1617 = dma.hbm_to_vmem [thread:$0]  (!%p2017_p11), %s2293_s9, 512, %s365_s29, [#allocation9], %s2277_s15, %s2277_s15, %s2278_s16  }
  0x4b   : > { %s2294_s26 = scalar_select %p2078_p9, 1, 0 }
  0x4c   : > { %2295 = sst [smem:[#allocation16_spill]] %s2084_s30  ;;  %p71_p0 = por %p70_p1, %p69_p12 }
  0x4d   : > { %s1439_s13 = sshll.u32 %s388_s12, 4  ;;  %s1474_s29 = sshll.u32 %s1895_s20, 8 }
  0x4e   : > { %s2091_s16 = scalar_lea.hbm %s2265_s1, %s1474_s29  ;;  %s392_s22 = scalar_lea.vmem [#allocation2], %s1439_s13 }
  0x4f   : > { %s399_s6 = sshll.u32 %s392_s22, 4  ;;  %p2095_p2 = pnand %p1630_p13, %p71_p0  ;;  %s2093_s6 = int_to_ptr.vmem [resolvable:$true] %s399_s6 }
  0x50   : > { %s2099_s28 = scalar_lea.sflag [#allocation3], %s388_s12  ;;  %s1795_s8 = scalar_lea.hbm %s2091_s16, 256 }
  0x51   : > { %p1796_p11 = scmp.ne.s32.totalorder %s2091_s16, %s1795_s8  ;;  %p1797_p3 = pneg %p2095_p2 }
  0x52   : > { %s1800_s13 = scalar_lea.hbm %s2265_s1, 512  ;;  %p1801_p12 = scmp.lt.s32.totalorder %s2091_s16, %s2265_s1 }
  0x53   : > { %p1798_p5 = pnand %p1797_p3, %p1796_p11  ;;  %p1802_p7 = scmp.lt.s32.totalorder %s1800_s13, %s1795_s8 }
  0x55   : > { %p1799_p10 = pneg %p1798_p5  ;;  %p1803_p1 = por %p1802_p7, %p1801_p12 }
  0x57   : > { %p1804_p13 = pnand %p1803_p1, %p1799_p10 }
  0x59   : > { %1807 = shalt.err (!%p1804_p13)
}
  0x5a   : > { %s1808_s12 = scalar_lea.vmem %s2093_s6, 256  ;;  %s1903_s9 = smov [#allocation2]  }
  0x5b   : > { %p1809_p0 = scmp.ne.s32.totalorder %s2093_s6, %s1808_s12  ;;  %s1813_s30 = sshll.u32 %s1903_s9, 4  ;;  %s1814_s30 = int_to_ptr.vmem [resolvable:$false] %s1813_s30 }
  0x5c   : > { %s1815_s15 = scalar_lea.vmem %s1814_s30, 512  ;;  %p1816_p5 = scmp.lt.s32.totalorder %s2093_s6, %s1814_s30 }
  0x5d   : > { %p1811_p6 = pnand %p1809_p0, %p1797_p3  ;;  %p1817_p9 = scmp.lt.s32.totalorder %s1815_s15, %s1808_s12 }
  0x5f   : > { %p1812_p11 = pneg %p1811_p6  ;;  %p1818_p4 = por %p1817_p9, %p1816_p5 }
  0x61   : > { %p1819_p8 = pnand %p1818_p4, %p1812_p11 }
  0x63   : > { %1822 = shalt.err (!%p1819_p8)
}
  0x64   : > { %s2297_s8 = smov 8   ;;  %s2298_s29 = smov 128  }
  0x65   : > { %1621 = dma.hbm_to_vmem [thread:$0]  (!%p2095_p2), %s2091_s16, 256, %s2093_s6, %s2099_s28, %s2298_s29, %s2298_s29, %s2297_s8  }
  0x66   : > { %p2299_p6 = scmp.ne.s32.totalorder %s2288_s25, 0 }
  0x67   : > { %s2126_s9 = sand.u32 (!%p2299_p6), 1, %s1887_s18   ;;  %p2300_p4 = scmp.ne.s32.totalorder (!%p2299_p6), %s2286_s23, 0 }
  0x68   : > { %411 = sbr.rel (%p2299_p6) target bundleno = 1654 (0x676), region = 64  ;;  %s1443_s30 = sshll.u32 (!%p2299_p6), %s2126_s9, 4 }
  0x69   : > { %s414_s13 = scalar_lea.sflag (!%p2299_p6), [#allocation3], %s2126_s9  ;;  %s417_s14 = scalar_lea.vmem (!%p2299_p6), [#allocation2], %s1443_s30 }
  0x6d   : > { %1866 = dma.done.wait (%p2300_p4), %s414_s13, 256  }
  0x6e   : > { %1868 = vsyncadd (%p2300_p4), %s414_s13, 4294967040  ;;  %p2301_p8 = scmp.eq.s32.totalorder %s1989_s21, 0 }
  0x70   : > { %1870 = dma.done.wait (%p2301_p8), [#allocation6], 1024   ;;  %p2302_p9 = pmov %p2301_p8 }
  0x71   : > { %p2303_p2 = pmov %p2301_p8 }
  0x72   : > { %1872 = vsyncadd (%p2302_p9), [#allocation6], 4294966272 }
  0x73   : > { %1874 = dma.done.wait (%p2303_p2), [#allocation9], 1024   ;;  %p2304_p3 = pmov %p2303_p2 }
  0x74   : > { %p476_p10 = scmp.lt.s32.totalorder %s1989_s21, 1  ;;  %vm485_vm0 = vcmask 261120   ;;  %v481_v0 = vld [vmem:[%s417_s14] sm:$0xff]  ;;  %v482_v1 = vld [vmem:[%s417_s14 + $0x8] sm:$0xff]  ;;  %v1904_v23 = vmov 0.0   ;;  %vm1905_vm1 = vmmov 0  }
  0x75   : > { %1876 = vsyncadd (%p2304_p3), [#allocation9], 4294966272  ;;  %v516_v3 = vsel %vm485_vm0, %v481_v0, 0.0  ;;  %v519_v5 = vsel %vm485_vm0, %v482_v1, 0.0  ;;  %v561_v21 = vld [vmem:[#allocation5 + $0x18] sm:$0xff]  ;;  %1510 = vmatprep.subr.mxu0 %v1904_v23  ;;  %v560_v24 = vld [vmem:[#allocation5 + $0x10] sm:$0xff]  ;;  %1518 = vmatprep.mubr.msk.f32.mxu0 %vm1905_vm1, %v1904_v23 }
  0x76   : > { %s477_s6 = scalar_select %p476_p10, %s1989_s21, 1  ;;  %517 = vadd.xlane.f32.xlu0 %v516_v3  ;;  %v565_v22 = vld [vmem:[#allocation7 + $0x18] sm:$0xff]  ;;  %v564_v25 = vld [vmem:[#allocation7 + $0x10] sm:$0xff]  ;;  %1511 = vmatpush3.msra.mxu0 %v561_v21  ;;  %v563_v26 = vld [vmem:[#allocation7 + $0x8] sm:$0xff]  ;;  %vm803_vm2 = vcmask 130048  }
  0x77   : > { %1521 = vmatprep.subr.mxu1 %v565_v22  ;;  %1512 = vmatprep.subr.mxu0 %v1904_v23  ;;  %v559_v27 = vld [vmem:[#allocation5 + $0x8] sm:$0xff]  ;;  %v558_v28 = vld [vmem:[#allocation5] sm:$0xff]  ;;  %v569_v30 = vld [vmem:[#allocation8 + $0x18] sm:$0xff]  ;;  %s1906_s14 = smov 112   ;;  %s1471_s25 = sshll.u32 %s1989_s21, 7 }
  0x78   : > { %s1449_s7 = sshll.u32 %s477_s6, 3  ;;  %1522 = vmatpush3.msra.mxu1 %v565_v22  ;;  %1513 = vmatpush3.msra.mxu0 %v560_v24  ;;  %v562_v29 = vld [vmem:[#allocation7] sm:$0xff]  ;;  %v568_v56 = vld [vmem:[#allocation8 + $0x10] sm:$0xff]  ;;  %v567_v57 = vld [vmem:[#allocation8 + $0x8] sm:$0xff]  ;;  %s1448_s6 = sshll.u32 %s2126_s9, 3 }
  0x79   : > { %s479_s16 = scalar_lea.vmem %s2264_s0, %s1449_s7  ;;  %1523 = vmatprep.subr.mxu1 %v564_v25  ;;  %1514 = vmatprep.subr.mxu0 %v1904_v23  ;;  %v1452_v41 = vld [vmem:[%s2268_s4] ss:$0 sm:$0xff]  ;;  %v571_v24 = vld [vmem:[#allocation10 + $0x8] sm:$0xff]  ;;  %s1310_s15 = scalar_lea.hbm %s2275_s11, %s1471_s25 }
  0x7a   : > { %v480_v2 = vld [vmem:[%s479_s16] sm:$0xff]  ;;  %520 = vadd.xlane.f32.xlu0 %v519_v5  ;;  %1524 = vmatpush3.msra.mxu1 %v564_v25  ;;  %s475_s16 = scalar_lea.vmem [#allocation11], %s1448_s6  ;;  %s1299_s8 = scalar_lea.sflag [#allocation4], %s2126_s9 }
  0x7b   : > { %v486_v4 = vsel %vm485_vm0, %v480_v2, 0.0  ;;  %1525 = vmatprep.subr.mxu1 %v563_v26  ;;  %1515 = vmatpush3.msra.mxu0 %v559_v27  ;;  %v1453_v43 = vld [vmem:[%s2269_s5] ss:$0 sm:$0xff]  ;;  %s1312_s28 = sshll.u32 %s475_s16, 4  ;;  %p2305_p7 = scmp.ne.s32.totalorder %s2294_s26, 0  ;;  %s1313_s28 = int_to_ptr.vmem [resolvable:$true] %s1312_s28 }
  0x7c   : > { %487 = vadd.xlane.f32.xlu1 %v486_v4  ;;  %1526 = vmatpush3.msra.mxu1 %v563_v26  ;;  %v1450_v49 = vld [vmem:[%s2266_s2] ss:$0 sm:$0xff]  ;;  %s1823_s29 = scalar_lea.vmem %s1313_s28, 128  ;;  %s1907_s30 = smov [#allocation11]  }
  0x7d   : > { %1516 = vmatprep.subr.mxu0 %v1904_v23  ;;  %1527 = vmatprep.subr.mxu1 %v562_v29  ;;  %v1451_v52 = vld [vmem:[%s2267_s3] ss:$0 sm:$0xff]  ;;  %p1824_p12 = scmp.ne.s32.totalorder %s1313_s28, %s1823_s29  ;;  %s1827_s21 = sshll.u32 %s1907_s30, 4  ;;  %s1828_s21 = int_to_ptr.vmem [resolvable:$false] %s1827_s21 }
  0x7e   : > { %1517 = vmatpush3.msra.mxu0 %v558_v28  ;;  %1528 = vmatpush3.msra.mxu1 %v562_v29  ;;  %v566_v58 = vld [vmem:[#allocation8] sm:$0xff]  ;;  %s1829_s13 = scalar_lea.vmem %s1828_s21, 256  ;;  %p1830_p0 = scmp.lt.s32.totalorder %s1313_s28, %s1828_s21 }
  0x7f   : > { %1532 = vmatprep.subr.mxu0 %v569_v30  ;;  %1543 = vmatprep.subr.mxu1 %v1904_v23  ;;  %v570_v28 = vld [vmem:[#allocation10] sm:$0xff]  ;;  %p1825_p1 = pnand %p1824_p12, %p2305_p7  ;;  %p1831_p11 = scmp.lt.s32.totalorder %s1829_s13, %s1823_s29 }
  0x81   : > { %p1826_p13 = pneg %p1825_p1  ;;  %p1832_p5 = por %p1831_p11, %p1830_p0 }
  0x83   : > { %p1833_p6 = pnand %p1832_p5, %p1826_p13 }
  0xff   : > { %v518_v6 = vpop.xlane.xlu0 %517 }
 0x100   : > { %v522_v8 = vmul.f32 0.03125, %v518_v6 }
 0x102   : > { %v524_v10 = vsub.f32 %v481_v0, %v522_v8 }
 0x103   : > { %v521_v12 = vpop.xlane.xlu0 %520 }
 0x104   : > { %v523_v13 = vmul.f32 0.03125, %v521_v12  ;;  %v526_v14 = vmul.f32 %v524_v10, %v524_v10 }
 0x105   : > { %v488_v7 = vpop.xlane.xlu1 %487 }
 0x106   : > { %v490_v9 = vmul.f32 0.03125, %v488_v7  ;;  %v525_v16 = vsub.f32 %v482_v1, %v523_v13  ;;  %v528_v17 = vsel %vm485_vm0, %v526_v14, 0.0 }
 0x107   : > { %529 = vadd.xlane.f32.xlu1 %v528_v17 }
 0x108   : > { %v2150_v11 = vsub.f32 %v480_v2, %v490_v9  ;;  %v527_v18 = vmul.f32 %v525_v16, %v525_v16 }
 0x10a   : > { %v492_v15 = vmul.f32 %v2150_v11, %v2150_v11  ;;  %v531_v20 = vsel %vm485_vm0, %v527_v18, 0.0 }
 0x10b   : > { %532 = vadd.xlane.f32.xlu0 %v531_v20 }
 0x10c   : > { %v493_v19 = vsel %vm485_vm0, %v492_v15, 0.0 }
 0x10d   : > { %494 = vadd.xlane.f32.xlu1 %v493_v19 }
 0x190   : > { %v530_v31 = vpop.xlane.xlu1 %529 }
 0x191   : > { %v534_v32 = vmul.f32 0.03125, %v530_v31 }
 0x193   : > { %v536_v33 = vadd.f32 1e-05, %v534_v32 }
 0x194   : > { %v533_v34 = vpop.xlane.xlu0 %532 }
 0x195   : > { %1677 = vrsqrt.f32 %v536_v33  ;;  %v535_v36 = vmul.f32 0.03125, %v533_v34  ;;  %v573_v33 = vld [vmem:[#allocation10 + $0x18] sm:$0xff]  ;;  %v572_v34 = vld [vmem:[#allocation10 + $0x10] sm:$0xff] }
 0x196   : > { %v495_v35 = vpop.xlane.xlu1 %494 }
 0x197   : > { %v496_v37 = vmul.f32 0.03125, %v495_v35  ;;  %v537_v38 = vadd.f32 1e-05, %v535_v36 }
 0x199   : > { %v497_v39 = vadd.f32 1e-05, %v496_v37  ;;  %1679 = vrsqrt.f32 %v537_v38 }
 0x19b   : > { %1681 = vrsqrt.f32 %v497_v39 }
 0x1a2   : > { %v1678_v40 = vpop.eup %1677 }
 0x1a3   : > { %v540_v42 = vmul.f32 %v1678_v40, %v524_v10 }
 0x1a5   : > { %v548_v44 = vmul.f32 %v1452_v41, %v540_v42  ;;  %v1469_v42 = vld [vmem:[%s2274_s10] ss:$0 sm:$0xff] }
 0x1a6   : > { %v1680_v45 = vpop.eup %1679 }
 0x1a7   : > { %v541_v47 = vmul.f32 %v1680_v45, %v525_v16  ;;  %v556_v48 = vadd.f32 %v1453_v43, %v548_v44 }
 0x1a8   : > { %v1682_v46 = vpop.eup %1681 }
 0x1a9   : > { %v499_v50 = vmul.f32 %v1682_v46, %v2150_v11  ;;  %v549_v51 = vmul.f32 %v1452_v41, %v541_v47  ;;  %1529 = vmatprep.mubr.msk.f32.mxu1 %vm485_vm0, %v556_v48 }
 0x1ab   : > { %v506_v53 = vmul.f32 %v1450_v49, %v499_v50  ;;  %v557_v54 = vadd.f32 %v1453_v43, %v549_v51 }
 0x1ad   : > { %v513_v55 = vadd.f32 %v1451_v52, %v506_v53  ;;  %1530 = vmatmul.mubr.msk.f32.vlgmr.msra.gmra.mxu1 %vm485_vm0, %v557_v54 }
 0x1ae   : > { %1547 = vmatprep.mubr.msk.f32.mxu1 %vm1905_vm1, %v1904_v23 }
 0x1af   : > { %1519 = vmatmul.mubr.msk.f32.vlgmr.msra.gmra.mxu0 %vm485_vm0, %v513_v55 }
 0x1b0   : > { %1533 = vmatpush3.msra.mxu0 %v569_v30  ;;  %1540 = vmatprep.mubr.msk.f32.mxu0 %vm485_vm0, %v556_v48 }
 0x1b1   : > { %1534 = vmatprep.subr.mxu0 %v568_v56 }
 0x1b2   : > { %1535 = vmatpush3.msra.mxu0 %v568_v56 }
 0x1b3   : > { %1536 = vmatprep.subr.mxu0 %v567_v57 }
 0x1b4   : > { %1537 = vmatpush3.msra.mxu0 %v567_v57 }
 0x1b5   : > { %1538 = vmatprep.subr.mxu0 %v566_v58 }
 0x1b6   : > { %1539 = vmatpush3.msra.mxu0 %v566_v58 }
 0x1b7   : > { %1541 = vmatmul.mubr.msk.f32.vlgmr.msra.gmra.mxu0 %vm485_vm0, %v557_v54  ;;  %1550 = vmatprep.subr.mxu0 %v1904_v23 }
 0x1b8   : > { %1554 = vmatprep.mubr.msk.f32.mxu0 %vm1905_vm1, %v1904_v23 }
 0x26d   : > { %v1531_v59 = vpop.f32.mrf.mxu1 }
 0x26e   : > { %972 = vrot.lane.b32.xlu0 %v1531_v59, %s1906_s14  ;;  %1544 = vmatpush3.xpose.msk.msra.mxu1 %vm803_vm2, %v1531_v59 }
 0x26f   : > { %v643_v60 = vpop.f32.mrf.mxu0  ;;  %v719_v61 = vpop.f32.mrf.mxu1  ;;  %1545 = vmatprep.subr.mxu1 %v1904_v23 }
 0x270   : > { %970 = vrot.lane.b32.xlu1 %v719_v61, %s1906_s14 }
 0x271   : > { %v1520_v62 = vpop.f32.mrf.mxu0 }
 0x272   : > { %1546 = vmatpush3.xpose.msk.msra.mxu1 %vm803_vm2, %v719_v61 }
 0x273   : > { %1557 = vmatprep.subr.mxu1 %v1904_v23 }
 0x274   : > { %968 = vrot.lane.b32.xlu1 %v643_v60, %s1906_s14 }
 0x275   : > { %1548 = vmatmul.mubr.msk.f32.vlgmr.msra.gmra.mxu1 %vm803_vm2, %v643_v60 }
 0x276   : > { %1561 = vmatprep.mubr.msk.f32.mxu1 %vm1905_vm1, %v1904_v23 }
 0x277   : > { %v1542_v63 = vpop.f32.mrf.mxu0 }
 0x278   : > { %1551 = vmatpush3.msra.mxu0 %v1542_v63 }
 0x279   : > { %v794_v0 = vpop.f32.mrf.mxu0  ;;  %1552 = vmatprep.subr.mxu0 %v1904_v23 }
 0x27a   : > { %1553 = vmatpush3.msra.mxu0 %v794_v0 }
 0x27b   : > { %1564 = vmatprep.subr.mxu0 %v1904_v23 }
 0x2e0   : > { %v973_v1 = vpop.permute.xlu0 %972 }
 0x2e1   : > { %1558 = vmatpush3.xpose.msk.msra.mxu1 %vm803_vm2, %v973_v1 }
 0x2e2   : > { %v971_v2 = vpop.permute.xlu1 %970  ;;  %1559 = vmatprep.subr.mxu1 %v1904_v23 }
 0x2e5   : > { %1560 = vmatpush3.xpose.msk.msra.mxu1 %vm803_vm2, %v971_v2 }
 0x2e6   : > { %v969_v3 = vpop.permute.xlu1 %968  ;;  %1578 = vmatprep.subr.mxu1 %v1904_v23 }
 0x2e8   : > { %1562 = vmatmul.mubr.msk.f32.vlgmr.msra.gmra.mxu1 %vm803_vm2, %v969_v3 }
 0x2e9   : > { %1582 = vmatprep.mubr.msk.f32.mxu1 %vm1905_vm1, %v1904_v23  ;;  %1579 = vmatpush3.msra.mxu1 %v571_v24 }
 0x2ea   : > { %1580 = vmatprep.subr.mxu1 %v1904_v23 }
 0x2eb   : > { %1581 = vmatpush3.msra.mxu1 %v570_v28 }
 0x335   : > { %v879_v4 = vpop.f32.mrf.mxu1 }
 0x336   : > { %v883_v5 = vmul.f32 0.25, %v879_v4 }
 0x337   : > { %v1549_v6 = vpop.f32.mrf.mxu1 }
 0x338   : > { %v884_v7 = vsel %vm803_vm2, %v883_v5, -inf }
 0x339   : > { %885 = vmax.xlane.f32.xlu1 %v884_v7 }
 0x34a   : > { %1066 = vrot.lane.b32.xlu1 %v1542_v63, %s1906_s14 }
 0x3a8   : > { %v1046_v8 = vpop.f32.mrf.mxu1 }
 0x3a9   : > { %v1050_v9 = vmul.f32 0.25, %v1046_v8 }
 0x3aa   : > { %v1563_v10 = vpop.f32.mrf.mxu1 }
 0x3ab   : > { %v1051_v11 = vsel %vm803_vm2, %v1050_v9, -inf }
 0x3ac   : > { %1052 = vmax.xlane.f32.xlu0 %v1051_v11 }
 0x3c2   : > { %v886_v12 = vpop.xlane.xlu1 %885 }
 0x3c3   : > { %v887_v13 = vsub.f32 %v883_v5, %v886_v12 }
 0x3c5   : > { %v888_v14 = vmul.f32 1.442695, %v887_v13 }
 0x3c6   : > { %v1067_v27 = vpop.permute.xlu1 %1066 }
 0x3c7   : > { %1683 = vpow2.f32 %v888_v14 }
 0x3d4   : > { %v1684_v15 = vpop.eup %1683 }
 0x3d5   : > { %v890_v16 = vsel %vm803_vm2, %v1684_v15, 0.0 }
 0x3d6   : > { %891 = vadd.xlane.f32.xlu0 %v890_v16 }
 0x435   : > { %v1053_v17 = vpop.xlane.xlu0 %1052 }
 0x436   : > { %v1054_v18 = vsub.f32 %v1050_v9, %v1053_v17 }
 0x438   : > { %v1055_v19 = vmul.f32 1.442695, %v1054_v18 }
 0x43a   : > { %1685 = vpow2.f32 %v1055_v19 }
 0x447   : > { %v1686_v20 = vpop.eup %1685 }
 0x448   : > { %v1057_v21 = vsel %vm803_vm2, %v1686_v20, 0.0 }
 0x449   : > { %1058 = vadd.xlane.f32.xlu0 %v1057_v21 }
 0x45f   : > { %1064 = vrot.lane.b32.xlu0 %v794_v0, %s1906_s14  ;;  %v892_v22 = vpop.xlane.xlu0 %891 }
 0x460   : > { %1687 = vrcp.f32 %v892_v22 }
 0x46d   : > { %v1688_v25 = vpop.eup %1687 }
 0x46e   : > { %v894_v26 = vmul.f32 %v1688_v25, %v1684_v15 }
 0x470   : > { %1555 = vmatmul.mubr.msk.f32.vlgmr.msra.gmra.mxu0 %vm803_vm2, %v894_v26 }
 0x471   : > { %1565 = vmatpush3.msra.mxu0 %v1067_v27  ;;  %1568 = vmatprep.mubr.msk.f32.mxu0 %vm1905_vm1, %v1904_v23 }
 0x472   : > { %1566 = vmatprep.subr.mxu0 %v1904_v23 }
 0x4d2   : > { %v1059_v29 = vpop.xlane.xlu0 %1058 }
 0x4d3   : > { %1689 = vrcp.f32 %v1059_v29 }
 0x4d6   : > { %v1065_v30 = vpop.permute.xlu0 %1064 }
 0x4d7   : > { %1567 = vmatpush3.msra.mxu0 %v1065_v30 }
 0x4d8   : > { %1571 = vmatprep.subr.mxu0 %v1904_v23 }
 0x4e0   : > { %v1690_v31 = vpop.eup %1689 }
 0x4e1   : > { %v1061_v32 = vmul.f32 %v1690_v31, %v1686_v20 }
 0x4e3   : > { %1569 = vmatmul.mubr.msk.f32.vlgmr.msra.gmra.mxu0 %vm803_vm2, %v1061_v32 }
 0x4e4   : > { %1572 = vmatpush3.msra.mxu0 %v573_v33  ;;  %1575 = vmatprep.mubr.msk.f32.mxu0 %vm1905_vm1, %v1904_v23 }
 0x4e5   : > { %1573 = vmatprep.subr.mxu0 %v1904_v23 }
 0x4e6   : > { %1574 = vmatpush3.msra.mxu0 %v572_v34 }
 0x530   : > { %v964_v35 = vpop.f32.mrf.mxu0 }
 0x531   : > { %1583 = vmatmul.mubr.msk.f32.vlgmr.msra.gmra.mxu1 %vm803_vm2, %v964_v35 }
 0x532   : > { %v1556_v36 = vpop.f32.mrf.mxu0 }
 0x5a3   : > { %v1139_v37 = vpop.f32.mrf.mxu0 }
 0x5a4   : > { %1576 = vmatmul.mubr.msk.f32.vlgmr.msra.gmra.mxu0 %vm803_vm2, %v1139_v37 }
 0x5a5   : > { %v1570_v38 = vpop.f32.mrf.mxu0 }
 0x5f1   : > { %v1285_v39 = vpop.f32.mrf.mxu1 }
 0x5f3   : > { %v1584_v40 = vpop.f32.mrf.mxu1 }
 0x664   : > { %v1212_v41 = vpop.f32.mrf.mxu0 }
 0x665   : > { %v1286_v23 = vadd.f32 %v1285_v39, %v1212_v41 }
 0x666   : > { %v1577_v43 = vpop.f32.mrf.mxu0 }
 0x667   : > { %v1296_v44 = vadd.f32 %v1469_v42, %v1286_v23 }
 0x669   : > { %1297 = vst.msk [vmem:[%s475_s16] sm:$0xff] %vm485_vm0, %v1296_v44 }
 0x66a   : > { %1836 = shalt.err (!%p1833_p6)
}
 0x66b   : > { %s1837_s14 = scalar_lea.hbm %s1310_s15, 128  ;;  %s1841_s7 = scalar_lea.hbm %s2275_s11, 256 }
 0x66c   : > { %p1838_p4 = scmp.ne.s32.totalorder %s1310_s15, %s1837_s14  ;;  %p1842_p2 = scmp.lt.s32.totalorder %s1310_s15, %s2275_s11 }
 0x66d   : > { %p1843_p3 = scmp.lt.s32.totalorder %s1841_s7, %s1837_s14 }
 0x66e   : > { %p1839_p8 = pnand %p1838_p4, %p2305_p7 }
 0x66f   : > { %p1844_p10 = por %p1843_p3, %p1842_p2 }
 0x670   : > { %p1840_p9 = pneg %p1839_p8 }
 0x672   : > { %p1845_p12 = pnand %p1844_p10, %p1840_p9 }
 0x674   : > { %1848 = shalt.err (!%p1845_p12)
}
 0x675   : > { %1603 = dma.vmem_to_hbm [thread:$0]  (%p2305_p7), %s1313_s28, 128, %s1310_s15, %s1299_s8  }
 0x676 PF: > { %s1324_s16 = sand.u32 1, %s1883_s17   ;;  %p2306_p1 = scmp.ne.s32.totalorder %s2287_s24, 0 }
 0x677   : > { %p2307_p13 = scmp.ge.s32.totalorder %s1895_s20, 2  ;;  %s1325_s22 = scalar_lea.sflag [#allocation4], %s1324_s16 }
 0x679   : > { %p1623_p0 = pnand %p2307_p13, %p2306_p1 }
 0x67b   : > { %p1624_p11 = pneg %p1623_p0 }
 0x67d   : > { %1878 = dma.done.wait (%p1624_p11), %s1325_s22, 128  }
 0x67e   : > { %1880 = vsyncadd (%p1624_p11), %s1325_s22, 4294967168  ;;  %s2308_s12 = sld [smem:[#allocation16_spill]]  ;;  %p26_p5 = scmp.ge.s32.totalorder %s2068_s27, 4  }
 0x67f   : > { %s2309_s17 = smov %s1887_s18  ;;  %s2310_s18 = smov %s1891_s19 }
 0x680   : > { %s2312_s20 = smov %s2068_s27  ;;  %28 = sbr.rel (!%p26_p5) target bundleno = 12 (0xc), region = 128 }
 0x684   : > { %s2311_s19 = smov %s2308_s12 }
 0x685   :  { %1330 = vsyncpa [#allocation3], 1 }
 0x686   :  { %1332 = vsyncpa [#allocation3 + $0x1], 1 }
 0x687   :  { %1333 = vsyncpa [#allocation6], 1 }
 0x688   :  { %1334 = vsyncpa [#allocation9], 1 }
 0x689   :  { %1335 = vsyncpa [#allocation4], 1 }
 0x68a   :  { %1337 = vsyncpa [#allocation4 + $0x1], 1 }

</bundles_post_ra>
